<compile_context>
chip_gen: v7x
topology: tpu7x:2x2x1
jax: 0.10.0
libtpu: 0.0.40
codegen_flags: <defaults>
</compile_context>

<pallas_src>
import functools

import jax
import jax.numpy as jnp
from jax import lax
from jax.experimental import pallas as pl
from jax.experimental.pallas import tpu as pltpu

_EPS = 1e-16

_LANE = 512                         # lane-dense minor dim (multiple of 128)
_SUBLANE = 8                        # sublane group
_GROUP_ELEMS = _SUBLANE * _LANE     # elements per (8, 512) slab = 4096
_CHUNK_GROUPS = 8                   # inner-loop chunk: 8 slabs = 128 KiB / input


@functools.lru_cache(maxsize=None)
def _device_plan():
    """Return (num_tensorcores, max_tile_groups) tuned per TPU generation."""
    kind = ""
    try:
        kind = jax.devices()[0].device_kind.lower()
    except Exception:  # pragma: no cover - defensive; fall back to safe defaults
        pass
    if "v7" in kind or "7x" in kind:
        # 2 TCs/chip; 256-group tiles (4 MiB/input) -> 16 MiB of double-buffered
        # inputs, inside the 32 MiB default scoped VMEM (64 MiB physical).
        return 2, 256
    if "v6" in kind:
        # 1 TC; 16 MiB of pipeline buffers < 32 MiB default scoped VMEM.
        return 1, 256
    # v5e / unknown: 128-group tiles (2 MiB/input) -> 8 MiB buffers < 16 MiB default.
    return 1, 128


def _consist_loss_kernel(x1_ref, x2_ref, out_ref, *, tile_groups, chunk,
                         valid_groups, ragged):
    # grid = (num_cores, steps). The (1, 8, LANE) output block is the per-core
    # vector accumulator, resident across the "arbitrary" reduction axis.
    step = pl.program_id(1)

    @pl.when(step == 0)
    def _init():
        out_ref[...] = jnp.zeros_like(out_ref)

    # Unclamped global index of this block's first slab. It matches the index_map
    # *before* clamping; blocks the index_map redirected (fully out-of-range ones)
    # get g0 >= valid_groups and are masked to a zero contribution below.
    g0 = (pl.program_id(0) * pl.num_programs(1) + step) * tile_groups

    def chunk_sum(start, size, acc):
        p1 = x1_ref[pl.ds(start, size)].astype(jnp.float32)
        p2 = x2_ref[pl.ds(start, size)].astype(jnp.float32)
        if ragged:
            gidx = g0 + start + lax.broadcasted_iota(jnp.int32, (size, 1, 1), 0)
            valid = gidx < valid_groups
            # Mask the INPUTS, not the product: out-of-bounds garbage can be
            # negative -> log(neg+eps) = NaN and 0 * NaN = NaN.
            p1 = jnp.where(valid, p1, 1.0)
            p2 = jnp.where(valid, p2, 1.0)
        d = (p2 - p1) * (jnp.log(p2 + _EPS) - jnp.log(p1 + _EPS))
        # Reduce only the leading (slab) axis: pure elementwise vreg adds.
        return acc + jnp.sum(d, axis=0)

    acc = jnp.zeros((_SUBLANE, _LANE), jnp.float32)
    n_full = tile_groups // chunk
    rem = tile_groups - n_full * chunk

    if n_full > 0:
        def body(j, a):
            start = pl.multiple_of(j * chunk, chunk)
            return chunk_sum(start, chunk, a)
        acc = lax.fori_loop(0, n_full, body, acc,
                            unroll=2 if n_full >= 2 else 1)
    if rem:
        acc = chunk_sum(n_full * chunk, rem, acc)

    out_ref[...] += acc[None]


@functools.partial(jax.jit, static_argnames=("size_average",))
def consist_loss(input1, input2, size_average=True):
    """input1, input2: (N, C, H, W) probability maps (same as the PyTorch module)."""
    if not size_average:
        # TODO(synk): size_average=False returns the per-pixel (N,H,W) KL map in
        # PyTorch; only the size-averaged scalar path is implemented here.
        raise NotImplementedError("only size_average=True is implemented")

    n, c, h, w = input1.shape
    pixels = n * h * w
    total = n * c * h * w
    itemsize = jnp.dtype(input1.dtype).itemsize

    # Single flatten (no jnp.pad copy of the full inputs any more).
    x1 = input1.reshape(-1)
    x2 = input2.reshape(-1)

    main_groups = total // _GROUP_ELEMS
    main = main_groups * _GROUP_ELEMS

    total_sum = jnp.zeros((), jnp.float32)

    if main_groups > 0:
        cores, max_tile = _device_plan()
        num_cores = cores if (cores > 1 and main_groups >= 16) else 1
        groups_per_core = pl.cdiv(main_groups, num_cores)
        steps = pl.cdiv(groups_per_core, max_tile)
        tile_groups = pl.cdiv(groups_per_core, steps)      # balanced; <= main_groups
        coverage = num_cores * steps * tile_groups
        ragged = coverage > main_groups                     # static
        last_block = (main_groups - 1) // tile_groups

        def in_index_map(cc, i):
            b = cc * steps + i
            if ragged:
                # Never start a block past the (unpadded) array; redirected blocks
                # are fully masked inside the kernel via the unclamped index.
                b = jnp.minimum(b, last_block)
            return (b, 0, 0)

        in_spec = pl.BlockSpec((tile_groups, _SUBLANE, _LANE), in_index_map)

        kernel = functools.partial(
            _consist_loss_kernel,
            tile_groups=tile_groups,
            chunk=min(_CHUNK_GROUPS, tile_groups),
            valid_groups=main_groups,
            ragged=ragged,
        )

        x1m = x1[:main].reshape(main_groups, _SUBLANE, _LANE)
        x2m = x2[:main].reshape(main_groups, _SUBLANE, _LANE)

        partials = pl.pallas_call(
            kernel,
            out_shape=jax.ShapeDtypeStruct((num_cores, _SUBLANE, _LANE), jnp.float32),
            grid_spec=pltpu.PrefetchScalarGridSpec(
                num_scalar_prefetch=0,
                grid=(num_cores, steps),
                in_specs=[in_spec, in_spec],
                out_specs=pl.BlockSpec((1, _SUBLANE, _LANE), lambda cc, i: (cc, 0, 0)),
            ),
            compiler_params=pltpu.CompilerParams(
                dimension_semantics=("parallel", "arbitrary"),
            ),
            cost_estimate=pl.CostEstimate(
                flops=6 * coverage * _GROUP_ELEMS,
                transcendentals=2 * coverage * _GROUP_ELEMS,
                bytes_accessed=2 * main * itemsize
                + num_cores * _SUBLANE * _LANE * 4,
            ),
        )(x1m, x2m)

        total_sum = total_sum + jnp.sum(partials)

    if main < total:
        # Sub-slab tail (< 4096 elements): plain JAX; avoids copying/padding the
        # whole input just to cover the ragged remainder.
        t1 = x1[main:].astype(jnp.float32)
        t2 = x2[main:].astype(jnp.float32)
        total_sum = total_sum + jnp.sum(
            (t2 - t1) * (jnp.log(t2 + _EPS) - jnp.log(t1 + _EPS)))

    return total_sum / (2.0 * pixels)


def _reference(input1, input2):
    eps = _EPS
    kl1 = jnp.mean(
        jnp.sum(input2 * (jnp.log(input2 + eps) - jnp.log(input1 + eps)), axis=1))
    kl2 = jnp.mean(
        jnp.sum(input1 * (jnp.log(input1 + eps) - jnp.log(input2 + eps)), axis=1))
    return (kl1 + kl2) / 2.0


if __name__ == "__main__":
    key = jax.random.PRNGKey(0)

    def make_inputs(shape, k):
        k1, k2 = jax.random.split(k)
        p1 = jax.nn.softmax(jax.random.normal(k1, shape, jnp.float32), axis=1)
        p2 = jax.nn.softmax(jax.random.normal(k2, shape, jnp.float32), axis=1)
        return p1, p2

    ka, kb, kc = jax.random.split(key, 3)

    # Case A (primary, small): 2 full (8,512) slabs + a 512-element JAX tail.
    p1a, p2a = make_inputs((2, 4, 34, 32), ka)
    out_a = jax.block_until_ready(consist_loss(p1a, p2a))
    ref_a = _reference(p1a, p2a)
    assert bool(jnp.isfinite(out_a)), out_a
    assert jnp.allclose(out_a, ref_a, rtol=5e-4, atol=1e-6), (out_a, ref_a)

    # Case B (medium): 257 slabs -> exercises the ragged last block (input masking
    # + clamped index_map) on every generation's tile plan, plus a JAX tail.
    p1b, p2b = make_inputs((2, 4, 363, 363), kb)
    out_b = jax.block_until_ready(consist_loss(p1b, p2b))
    ref_b = _reference(p1b, p2b)
    assert bool(jnp.isfinite(out_b)), out_b
    assert jnp.allclose(out_b, ref_b, rtol=5e-4, atol=1e-6), (out_b, ref_b)

    # Case C (tiny): fewer than 4096 elements -> pure-JAX tail path.
    p1c, p2c = make_inputs((2, 4, 16, 16), kc)
    out_c = jax.block_until_ready(consist_loss(p1c, p2c))
    ref_c = _reference(p1c, p2c)
    assert jnp.allclose(out_c, ref_c, rtol=5e-4, atol=1e-6), (out_c, ref_c)

    print("KERNEL_OK")
</pallas_src>

<mosaic_0001>
module attributes {stable_mosaic.version = 11 : i64} {
  func.func @_consist_loss_kernel(%arg0: i32, %arg1: i32, %arg2: memref<2x8x512xf32, #tpu.memory_space<vmem>>, %arg3: memref<2x8x512xf32, #tpu.memory_space<vmem>>, %arg4: memref<1x8x512xf32, #tpu.memory_space<vmem>>) attributes {dimension_semantics = [#tpu.dimension_semantics<parallel>, #tpu.dimension_semantics<arbitrary>], iteration_bounds = array<i64: 1, 1>, scalar_prefetch = 0 : i64, scratch_operands = 0 : i64, tpu.core_type = #tpu.core_type<tc>, window_params = [{transform_indices = @transform_0, window_bounds = array<i64: 2, 8, 512>}, {transform_indices = @transform_1, window_bounds = array<i64: 2, 8, 512>}, {transform_indices = @transform_2, window_bounds = array<i64: 1, 8, 512>}]} {
    %c0_i32 = arith.constant 0 : i32
    %0 = arith.cmpi eq, %arg1, %c0_i32 : i32
    %1 = arith.extui %0 : i1 to i32
    %c0_i32_0 = arith.constant 0 : i32
    %2 = arith.cmpi ne, %1, %c0_i32_0 : i32
    scf.if %2 {
      %cst_14 = arith.constant 0.000000e+00 : f32
      %25 = vector.broadcast %cst_14 : f32 to vector<1x8x512xf32>
      %c0_15 = arith.constant 0 : index
      %c0_16 = arith.constant 0 : index
      %c0_17 = arith.constant 0 : index
      %26 = vector.load %arg4[%c0_15, %c0_16, %c0_17] : memref<1x8x512xf32, #tpu.memory_space<vmem>>, vector<1x8x512xf32>
      tpu.vector_store %arg4[%c0_15, %c0_16, %c0_17], %25 {strides = array<i32>} : memref<1x8x512xf32, #tpu.memory_space<vmem>>, vector<1x8x512xf32>,
    } else {
    }
    %cst = arith.constant 0.000000e+00 : f32
    %3 = vector.broadcast %cst : f32 to vector<8x512xf32>
    %c0_i32_1 = arith.constant 0 : i32
    %c2_i32 = arith.constant 2 : i32
    %4 = arith.muli %c0_i32_1, %c2_i32 : i32
    %5 = tpu.assume_multiple %4, 2 : i32
    %6 = arith.index_cast %5 : i32 to index
    %c0 = arith.constant 0 : index
    %c0_2 = arith.constant 0 : index
    %7 = vector.load %arg2[%6, %c0, %c0_2] : memref<2x8x512xf32, #tpu.memory_space<vmem>>, vector<2x8x512xf32>
    %8 = arith.index_cast %5 : i32 to index
    %c0_3 = arith.constant 0 : index
    %c0_4 = arith.constant 0 : index
    %9 = vector.load %arg3[%8, %c0_3, %c0_4] : memref<2x8x512xf32, #tpu.memory_space<vmem>>, vector<2x8x512xf32>
    %10 = arith.subf %9, %7 : vector<2x8x512xf32>
    %cst_5 = arith.constant 1.000000e-16 : f32
    %11 = vector.broadcast %cst_5 : f32 to vector<2x8x512xf32>
    %12 = arith.addf %9, %11 : vector<2x8x512xf32>
    %13 = math.log %12 : vector<2x8x512xf32>
    %cst_6 = arith.constant 1.000000e-16 : f32
    %14 = vector.broadcast %cst_6 : f32 to vector<2x8x512xf32>
    %15 = arith.addf %7, %14 : vector<2x8x512xf32>
    %16 = math.log %15 : vector<2x8x512xf32>
    %17 = arith.subf %13, %16 : vector<2x8x512xf32>
    %18 = arith.mulf %10, %17 : vector<2x8x512xf32>
    %cst_7 = arith.constant dense<0.000000e+00> : vector<8x512xf32>
    %19 = vector.multi_reduction <add>, %18, %cst_7 [0] : vector<2x8x512xf32> to vector<8x512xf32>
    %20 = arith.addf %3, %19 : vector<8x512xf32>
    %c1_i32 = arith.constant 1 : i32
    %c0_8 = arith.constant 0 : index
    %c0_9 = arith.constant 0 : index
    %c0_10 = arith.constant 0 : index
    %21 = vector.load %arg4[%c0_8, %c0_9, %c0_10] : memref<1x8x512xf32, #tpu.memory_space<vmem>>, vector<1x8x512xf32>
    %22 = vector.shape_cast %20 : vector<8x512xf32> to vector<1x8x512xf32>
    %23 = arith.addf %21, %22 : vector<1x8x512xf32>
    %c0_11 = arith.constant 0 : index
    %c0_12 = arith.constant 0 : index
    %c0_13 = arith.constant 0 : index
    %24 = vector.load %arg4[%c0_11, %c0_12, %c0_13] : memref<1x8x512xf32, #tpu.memory_space<vmem>>, vector<1x8x512xf32>
    tpu.vector_store %arg4[%c0_11, %c0_12, %c0_13], %23 {strides = array<i32>} : memref<1x8x512xf32, #tpu.memory_space<vmem>>, vector<1x8x512xf32>,
    return
  }
  func.func @transform_0(%arg0: i32, %arg1: i32) -> (i32, i32, i32) {
    %c1_i32 = arith.constant 1 : i32
    %0 = arith.muli %arg0, %c1_i32 : i32
    %1 = arith.addi %0, %arg1 : i32
    %c0_i32 = arith.constant 0 : i32
    %c0_i32_0 = arith.constant 0 : i32
    %c0_i32_1 = arith.constant 0 : i32
    return %1, %c0_i32, %c0_i32_0 : i32, i32, i32
  }
  func.func @transform_1(%arg0: i32, %arg1: i32) -> (i32, i32, i32) {
    %c1_i32 = arith.constant 1 : i32
    %0 = arith.muli %arg0, %c1_i32 : i32
    %1 = arith.addi %0, %arg1 : i32
    %c0_i32 = arith.constant 0 : i32
    %c0_i32_0 = arith.constant 0 : i32
    %c0_i32_1 = arith.constant 0 : i32
    return %1, %c0_i32, %c0_i32_0 : i32, i32, i32
  }
  func.func @transform_2(%arg0: i32, %arg1: i32) -> (i32, i32, i32) {
    %c0_i32 = arith.constant 0 : i32
    %c0_i32_0 = arith.constant 0 : i32
    %c0_i32_1 = arith.constant 0 : i32
    return %arg0, %c0_i32, %c0_i32_0 : i32, i32, i32
  }
}

</mosaic_0001>

<bundles_post_ra>
// kernel: consist_loss.1
= control target key start
LH: loop header
LB: loop body
LE: loop exit
PB: predicated region body
PF: predicated region fallthrough
CT: control target
= control target key end

     0   :  { %s370_s0 = inlined_call_operand.vmem [shape: f32[2,8,512], index: 0, kind: input, shape index: {}]   ;;  %s371_s1 = inlined_call_operand.vmem [shape: f32[2,8,512], index: 1, kind: input, shape index: {}]   ;;  %s372_s2 = inlined_call_operand.vmem [shape: f32[1,8,512], index: 2, kind: output, shape index: {}]  }
   0x1   :  { %v249_v0 = vld [vmem:[%s370_s0] sm:$0xff]  ;;  %v273_v8 = vld [vmem:[%s370_s0 + $0x8] sm:$0xff]  ;;  %v295_v14 = vld [vmem:[%s371_s1 + $0x10] sm:$0xff] }
   0x2   :  { %v254_v1 = vld [vmem:[%s370_s0 + $0x20] sm:$0xff]  ;;  %v122_v5 = vadd.f32 1e-16, %v249_v0  ;;  %v278_v9 = vld [vmem:[%s371_s1 + $0x8] sm:$0xff]  ;;  %v123_v15 = vadd.f32 1e-16, %v273_v8 }
   0x3   :  { %v259_v2 = vld [vmem:[%s371_s1] sm:$0xff]  ;;  %v126_v7 = vadd.f32 1e-16, %v254_v1  ;;  %v283_v10 = vld [vmem:[%s370_s0 + $0x28] sm:$0xff]  ;;  %v99_v12 = vadd.f32 1e-16, %v278_v9  ;;  %v91_v51 = vsub.f32 %v278_v9, %v273_v8 }
   0x4   :  { %v264_v3 = vld [vmem:[%s371_s1 + $0x20] sm:$0xff]  ;;  %v98_v4 = vadd.f32 1e-16, %v259_v2  ;;  %v288_v11 = vld [vmem:[%s371_s1 + $0x28] sm:$0xff]  ;;  %v301_v16 = vld [vmem:[%s371_s1 + $0x30] sm:$0xff]  ;;  %v90_v38 = vsub.f32 %v259_v2, %v249_v0 }
   0x5   :  { %v102_v6 = vadd.f32 1e-16, %v264_v3  ;;  %v103_v13 = vadd.f32 1e-16, %v288_v11  ;;  %v127_v17 = vadd.f32 1e-16, %v283_v10  ;;  %v94_v41 = vsub.f32 %v264_v3, %v254_v1 }
   0x6   :  { %199 = vlog2.f32 %v98_v4  ;;  %v307_v18 = vld [vmem:[%s370_s0 + $0x10] sm:$0xff]  ;;  %v100_v20 = vadd.f32 1e-16, %v295_v14  ;;  %v104_v21 = vadd.f32 1e-16, %v301_v16  ;;  %v319_v22 = vld [vmem:[%s371_s1 + $0x18] sm:$0xff]  ;;  %v95_v55 = vsub.f32 %v288_v11, %v283_v10 }
   0x7   :  { %201 = vlog2.f32 %v102_v6  ;;  %v312_v19 = vld [vmem:[%s370_s0 + $0x30] sm:$0xff]  ;;  %v124_v23 = vadd.f32 1e-16, %v307_v18  ;;  %v325_v24 = vld [vmem:[%s371_s1 + $0x38] sm:$0xff]  ;;  %v101_v28 = vadd.f32 1e-16, %v319_v22  ;;  %v92_v2 = vsub.f32 %v295_v14, %v307_v18 }
   0x8   :  { %203 = vlog2.f32 %v122_v5  ;;  %v128_v25 = vadd.f32 1e-16, %v312_v19  ;;  %v331_v26 = vld [vmem:[%s370_s0 + $0x18] sm:$0xff]  ;;  %v105_v29 = vadd.f32 1e-16, %v325_v24  ;;  %v96_v6 = vsub.f32 %v301_v16, %v312_v19 }
   0x9   :  { %205 = vlog2.f32 %v126_v7  ;;  %v336_v27 = vld [vmem:[%s370_s0 + $0x38] sm:$0xff]  ;;  %v125_v31 = vadd.f32 1e-16, %v331_v26  ;;  %v93_v18 = vsub.f32 %v319_v22, %v331_v26 }
   0xa   :  { %207 = vlog2.f32 %v99_v12  ;;  %v129_v34 = vadd.f32 1e-16, %v336_v27  ;;  %v97_v16 = vsub.f32 %v325_v24, %v336_v27 }
   0xb   :  { %209 = vlog2.f32 %v103_v13 }
   0xc   :  { %211 = vlog2.f32 %v123_v15 }
   0xd   :  { %213 = vlog2.f32 %v127_v17 }
   0xe   :  { %215 = vlog2.f32 %v100_v20 }
   0xf   :  { %217 = vlog2.f32 %v104_v21 }
  0x10   :  { %v200_v30 = vpop.eup %199  ;;  %219 = vlog2.f32 %v124_v23 }
  0x11   :  { %v202_v32 = vpop.eup %201  ;;  %v107_v33 = vmul.f32 0.6931472, %v200_v30  ;;  %221 = vlog2.f32 %v128_v25 }
  0x12   :  { %v204_v35 = vpop.eup %203  ;;  %v115_v36 = vmul.f32 0.6931472, %v202_v32  ;;  %223 = vlog2.f32 %v101_v28 }
  0x13   :  { %v206_v37 = vpop.eup %205  ;;  %v131_v39 = vmul.f32 0.6931472, %v204_v35  ;;  %225 = vlog2.f32 %v105_v29 }
  0x14   :  { %v208_v40 = vpop.eup %207  ;;  %v139_v42 = vmul.f32 0.6931472, %v206_v37  ;;  %227 = vlog2.f32 %v125_v31 }
  0x15   :  { %v210_v43 = vpop.eup %209  ;;  %v146_v44 = vsub.f32 %v107_v33, %v131_v39  ;;  %v109_v45 = vmul.f32 0.6931472, %v208_v40  ;;  %229 = vlog2.f32 %v129_v34 }
  0x16   :  { %v212_v46 = vpop.eup %211  ;;  %v150_v47 = vsub.f32 %v115_v36, %v139_v42  ;;  %v117_v48 = vmul.f32 0.6931472, %v210_v43 }
  0x17   :  { %v214_v49 = vpop.eup %213  ;;  %v154_v50 = vmul.f32 %v146_v44, %v90_v38  ;;  %v133_v52 = vmul.f32 0.6931472, %v212_v46 }
  0x18   :  { %v216_v53 = vpop.eup %215  ;;  %v158_v54 = vmul.f32 %v150_v47, %v94_v41  ;;  %v141_v56 = vmul.f32 0.6931472, %v214_v49 }
  0x19   :  { %v218_v57 = vpop.eup %217  ;;  %v147_v58 = vsub.f32 %v109_v45, %v133_v52  ;;  %v111_v59 = vmul.f32 0.6931472, %v216_v53 }
  0x1a   :  { %v220_v60 = vpop.eup %219  ;;  %v162_v61 = vadd.f32 %v158_v54, %v154_v50  ;;  %v151_v62 = vsub.f32 %v117_v48, %v141_v56  ;;  %v119_v63 = vmul.f32 0.6931472, %v218_v57 }
  0x1b   :  { %v222_v0 = vpop.eup %221  ;;  %v155_v1 = vmul.f32 %v147_v58, %v91_v51  ;;  %v135_v3 = vmul.f32 0.6931472, %v220_v60 }
  0x1c   :  { %v224_v4 = vpop.eup %223  ;;  %v159_v5 = vmul.f32 %v151_v62, %v95_v55  ;;  %v143_v7 = vmul.f32 0.6931472, %v222_v0  ;;  %178 = vst [vmem:[%s372_s2] sm:$0xff] %v162_v61 }
  0x1d   :  { %v226_v8 = vpop.eup %225  ;;  %v148_v9 = vsub.f32 %v111_v59, %v135_v3  ;;  %v113_v10 = vmul.f32 0.6931472, %v224_v4 }
  0x1e   :  { %v228_v11 = vpop.eup %227  ;;  %v163_v12 = vadd.f32 %v159_v5, %v155_v1  ;;  %v152_v13 = vsub.f32 %v119_v63, %v143_v7  ;;  %v121_v15 = vmul.f32 0.6931472, %v226_v8 }
  0x1f   :  { %v230_v17 = vpop.eup %229  ;;  %v156_v14 = vmul.f32 %v148_v9, %v92_v2  ;;  %v137_v20 = vmul.f32 0.6931472, %v228_v11 }
  0x20   :  { %v160_v21 = vmul.f32 %v152_v13, %v96_v6  ;;  %v145_v19 = vmul.f32 0.6931472, %v230_v17  ;;  %179 = vst [vmem:[%s372_s2 + $0x8] sm:$0xff] %v163_v12 }
  0x21   :  { %v149_v23 = vsub.f32 %v113_v10, %v137_v20 }
  0x22   :  { %v164_v25 = vadd.f32 %v160_v21, %v156_v14  ;;  %v153_v28 = vsub.f32 %v121_v15, %v145_v19 }
  0x23   :  { %v157_v29 = vmul.f32 %v149_v23, %v93_v18 }
  0x24   :  { %v161_v30 = vmul.f32 %v153_v28, %v97_v16  ;;  %180 = vst [vmem:[%s372_s2 + $0x10] sm:$0xff] %v164_v25 }
  0x26   :  { %v165_v22 = vadd.f32 %v161_v30, %v157_v29 }
  0x28   :  { %181 = vst [vmem:[%s372_s2 + $0x18] sm:$0xff] %v165_v22 }

</bundles_post_ra>
